<compile_context>
chip_gen: v5e
topology: v5e:2x2
jax: 0.10.0
libtpu: 0.0.40
codegen_flags: <defaults>
</compile_context>

<pallas_src>
import functools

import jax
import jax.numpy as jnp
from jax.experimental import pallas as pl
from jax.experimental.pallas import tpu as pltpu


def _pick_tile(n, target, mult=8):
    """Largest multiple-of-`mult` divisor of n that is <= target, else n."""
    if n <= target:
        return n
    t = (target // mult) * mult
    while t >= mult:
        if n % t == 0:
            return t
        t -= mult
    return n


# ----------------------------------------------------------------------------
# GAT stage 1: fc projection, heads fused (one wide matmul per metapath).
# ----------------------------------------------------------------------------
def gat_project_kernel(h_ref, w_ref, out_ref):
    out_ref[0] = jnp.dot(h_ref[...], w_ref[0], preferred_element_type=jnp.float32)


def gat_project(h, w_all):
    M, Fin, HF = w_all.shape
    N = h.shape[0]
    tn = _pick_tile(N, 512)
    return pl.pallas_call(
        gat_project_kernel,
        out_shape=jax.ShapeDtypeStruct((M, N, HF), jnp.float32),
        grid=(M, N // tn),
        in_specs=[
            pl.BlockSpec((tn, Fin), lambda m, i: (i, 0)),
            pl.BlockSpec((1, Fin, HF), lambda m, i: (m, 0, 0)),
        ],
        out_specs=pl.BlockSpec((1, tn, HF), lambda m, i: (m, i, 0)),
        compiler_params=pltpu.CompilerParams(
            dimension_semantics=("parallel", "parallel")),
    )(h, w_all)


# ----------------------------------------------------------------------------
# GAT stage 2: masked attention + aggregation, tiled over destination rows.
# One (metapath, dst_tile) per grid point; heads handled by a static loop.
# ----------------------------------------------------------------------------
def gat_attn_kernel(featS_ref, featD_ref, al_ref, ar_ref, b_ref, adj_ref,
                    out_ref, *, num_heads, head_dim):
    feat_s = featS_ref[0]            # (N, H*Fout)   all source nodes (f32)
    feat_d = featD_ref[0]            # (TD, H*Fout)  dst rows of this tile (f32)
    adj = adj_ref[0]                 # (TD, N)       bf16 edge mask (dst, src)
    al_all = al_ref[0]               # (H, Fout)     "attn_l" (source)
    ar_all = ar_ref[0]               # (H, Fout)     "attn_r" (destination)
    bias = b_ref[0]                  # (1, H*Fout)

    heads = []
    for hd in range(num_heads):
        lo = hd * head_dim
        f_s = feat_s[:, lo:lo + head_dim]                 # (N, Fout)
        f_d = feat_d[:, lo:lo + head_dim]                 # (TD, Fout)
        al_h = al_all[hd:hd + 1, :]                       # (1, Fout)
        ar_h = ar_all[hd:hd + 1, :]                       # (1, Fout)

        # dst-side score via VPU reduce (no thin matmul); src-side score keeps
        # the small matmul formulation (output is already lane-dense (1, N)).
        er = jnp.sum(f_d * ar_h, axis=-1, keepdims=True)                  # (TD, 1)
        el = jnp.dot(al_h, f_s.T, preferred_element_type=jnp.float32)     # (1, N)

        e = er + el                                       # e[dst,src] = er[dst]+el[src]
        e = jnp.where(e > 0, e, 0.2 * e)                  # LeakyReLU(0.2)
        e = jnp.where(adj > 0, e, -1e9)                   # mask non-edges (f32 math)
        e = e - jnp.max(e, axis=-1, keepdims=True)        # edge_softmax per dst row
        p = jnp.exp(e)
        alpha = p / jnp.sum(p, axis=-1, keepdims=True)    # (TD, N)

        # Aggregation matmul in bf16 operands, f32 accumulation.
        rst = jnp.dot(alpha.astype(jnp.bfloat16), f_s.astype(jnp.bfloat16),
                      preferred_element_type=jnp.float32)                  # (TD, Fout)
        heads.append(rst)

    rst_all = jnp.concatenate(heads, axis=-1) + bias                       # (TD, H*Fout)
    # ELU without overflowing exp on the positive branch.
    out_ref[0] = jnp.where(rst_all > 0, rst_all,
                           jnp.exp(jnp.minimum(rst_all, 0.0)) - 1.0)


def gat_attention(feat, adj_bf16, al_all, ar_all, b_all, *, num_heads):
    M, N, HF = feat.shape
    head_dim = HF // num_heads
    td = _pick_tile(N, 256, mult=16)     # bounds VMEM for (TD,N) temporaries
    kern = functools.partial(gat_attn_kernel, num_heads=num_heads,
                             head_dim=head_dim)
    return pl.pallas_call(
        kern,
        out_shape=jax.ShapeDtypeStruct((M, N, HF), jnp.float32),
        grid=(M, N // td),
        in_specs=[
            pl.BlockSpec((1, N, HF), lambda m, d: (m, 0, 0)),     # feat (all src)
            pl.BlockSpec((1, td, HF), lambda m, d: (m, d, 0)),    # feat (dst tile)
            pl.BlockSpec((1, num_heads, head_dim), lambda m, d: (m, 0, 0)),
            pl.BlockSpec((1, num_heads, head_dim), lambda m, d: (m, 0, 0)),
            pl.BlockSpec((1, 1, HF), lambda m, d: (m, 0, 0)),
            pl.BlockSpec((1, td, N), lambda m, d: (m, d, 0)),     # bf16 adjacency
        ],
        out_specs=pl.BlockSpec((1, td, HF), lambda m, d: (m, d, 0)),
        compiler_params=pltpu.CompilerParams(
            dimension_semantics=("parallel", "parallel"),
            vmem_limit_bytes=48 * 1024 * 1024),
    )(feat, feat, al_all, ar_all, b_all, adj_bf16)


# ----------------------------------------------------------------------------
# SemanticAttention: (1) accumulate per-metapath mean scores over node tiles,
# (2) softmax over metapaths + beta-weighted sum, tiled over node rows.
# ----------------------------------------------------------------------------
def sem_scores_kernel(z_ref, w1_ref, b1_ref, w2r_ref, out_ref, *, num_paths):
    @pl.when(pl.program_id(0) == 0)
    def _():
        out_ref[...] = jnp.zeros_like(out_ref)

    w1 = w1_ref[...]                  # (D, Hd)
    b1 = b1_ref[...]                  # (1, Hd)
    w2r = w2r_ref[...]                # (1, Hd)   second Linear weight (row form)
    parts = []
    for m in range(num_paths):
        hp = jnp.tanh(jnp.dot(z_ref[m], w1, preferred_element_type=jnp.float32) + b1)
        s = jnp.sum(hp * w2r, axis=-1, keepdims=True)     # (TN, 1)  VPU reduce
        parts.append(jnp.sum(s, axis=0, keepdims=True))   # (1, 1)   partial sum
    out_ref[...] += jnp.concatenate(parts, axis=-1)       # (1, M)


def semantic_scores(z, w1, b1, w2r):
    M, N, D = z.shape
    Hd = w1.shape[1]
    tn = _pick_tile(N, 512)
    return pl.pallas_call(
        functools.partial(sem_scores_kernel, num_paths=M),
        out_shape=jax.ShapeDtypeStruct((1, M), jnp.float32),
        grid=(N // tn,),
        in_specs=[
            pl.BlockSpec((M, tn, D), lambda i: (0, i, 0)),
            pl.BlockSpec((D, Hd), lambda i: (0, 0)),
            pl.BlockSpec((1, Hd), lambda i: (0, 0)),
            pl.BlockSpec((1, Hd), lambda i: (0, 0)),
        ],
        out_specs=pl.BlockSpec((1, M), lambda i: (0, 0)),
        compiler_params=pltpu.CompilerParams(dimension_semantics=("arbitrary",)),
    )(z, w1, b1, w2r)


def sem_combine_kernel(scores_ref, z_ref, out_ref, *, num_paths, inv_n):
    s = scores_ref[...] * inv_n                           # mean over nodes
    s = s - jnp.max(s, axis=-1, keepdims=True)
    p = jnp.exp(s)
    beta = p / jnp.sum(p, axis=-1, keepdims=True)         # (1, M) softmax over paths
    acc = beta[:, 0:1] * z_ref[0]
    for m in range(1, num_paths):
        acc = acc + beta[:, m:m + 1] * z_ref[m]
    out_ref[...] = acc


def semantic_combine(scores, z):
    M, N, D = z.shape
    tn = _pick_tile(N, 512)
    return pl.pallas_call(
        functools.partial(sem_combine_kernel, num_paths=M, inv_n=1.0 / N),
        out_shape=jax.ShapeDtypeStruct((N, D), jnp.float32),
        grid=(N // tn,),
        in_specs=[
            pl.BlockSpec((1, M), lambda i: (0, 0)),
            pl.BlockSpec((M, tn, D), lambda i: (0, i, 0)),
        ],
        out_specs=pl.BlockSpec((tn, D), lambda i: (i, 0)),
        compiler_params=pltpu.CompilerParams(dimension_semantics=("parallel",)),
    )(scores, z)


# ----------------------------------------------------------------------------
# Final predict Linear, tiled over rows.
# ----------------------------------------------------------------------------
def linear_kernel(x_ref, w_ref, b_ref, out_ref):
    out_ref[...] = (jnp.dot(x_ref[...], w_ref[...],
                            preferred_element_type=jnp.float32) + b_ref[...])


def linear(x, w, b):
    N, Din = x.shape
    Dout = w.shape[1]
    tm = _pick_tile(N, 512)
    return pl.pallas_call(
        linear_kernel,
        out_shape=jax.ShapeDtypeStruct((N, Dout), jnp.float32),
        grid=(N // tm,),
        in_specs=[
            pl.BlockSpec((tm, Din), lambda i: (i, 0)),
            pl.BlockSpec((Din, Dout), lambda i: (0, 0)),
            pl.BlockSpec((1, Dout), lambda i: (0, 0)),
        ],
        out_specs=pl.BlockSpec((tm, Dout), lambda i: (i, 0)),
        compiler_params=pltpu.CompilerParams(dimension_semantics=("parallel",)),
    )(x, w, b)


# ----------------------------------------------------------------------------
# HAN forward (glue) + deterministic parameter init
# ----------------------------------------------------------------------------
def han_forward(x, adj_all, params):
    adj_bf16 = adj_all.astype(jnp.bfloat16)   # mask only needs `> 0`; 2x traffic cut
    h = x
    for lp in params["layers"]:
        feat = gat_project(h, lp["w"])                                      # (M, N, H*Fout)
        z = gat_attention(feat, adj_bf16, lp["al"], lp["ar"], lp["b"],
                          num_heads=lp["heads"])                            # (M, N, H*Fout)
        scores = semantic_scores(z, lp["sa_w1"], lp["sa_b1"], lp["sa_w2r"]) # (1, M)
        h = semantic_combine(scores, z)                                     # (N, H*Fout)
    return linear(h, params["pred_w"], params["pred_b"])


def init_params(key, num_meta_paths, in_size, hidden_size, out_size, num_heads,
                sem_hidden=128):
    layers = []
    dim_in = in_size
    for heads in num_heads:
        key, *ks = jax.random.split(key, 8)
        hf = hidden_size * heads
        layers.append(dict(
            heads=heads,
            # fc weights with heads fused along the output dim: (M, Fin, H*Fout)
            w=0.1 * jax.random.normal(ks[0], (num_meta_paths, dim_in, hf), jnp.float32),
            al=0.1 * jax.random.normal(ks[1], (num_meta_paths, heads, hidden_size), jnp.float32),
            ar=0.1 * jax.random.normal(ks[2], (num_meta_paths, heads, hidden_size), jnp.float32),
            b=0.1 * jax.random.normal(ks[3], (num_meta_paths, 1, hf), jnp.float32),
            sa_w1=0.1 * jax.random.normal(ks[4], (hf, sem_hidden), jnp.float32),
            sa_b1=0.1 * jax.random.normal(ks[5], (1, sem_hidden), jnp.float32),
            sa_w2r=0.1 * jax.random.normal(ks[6], (1, sem_hidden), jnp.float32),
        ))
        dim_in = hf
    key, k1, k2 = jax.random.split(key, 3)
    pred_w = 0.1 * jax.random.normal(k1, (dim_in, out_size), jnp.float32)
    pred_b = 0.1 * jax.random.normal(k2, (1, out_size), jnp.float32)
    return dict(layers=layers, pred_w=pred_w, pred_b=pred_b)


if __name__ == "__main__":
    key = jax.random.PRNGKey(0)
    M, N = 2, 16                       # metapaths, nodes
    in_size, hidden_size, out_size = 16, 8, 4
    num_heads = [2, 2]

    kx, kp = jax.random.split(key)
    x = jax.random.normal(kx, (N, in_size), jnp.float32)

    # deterministic dense metapath adjacencies with self-loops; adj[m, dst, src]
    base = jnp.arange(N)[:, None] + jnp.arange(N)[None, :]
    adj = jnp.stack([((base % (m + 3)) == 0).astype(jnp.float32) for m in range(M)], axis=0)
    adj = jnp.maximum(adj, jnp.eye(N, dtype=jnp.float32)[None])

    params = init_params(kp, M, in_size, hidden_size, out_size, num_heads)

    out = han_forward(x, adj, params)
    jax.block_until_ready(out)
    assert out.shape == (N, out_size) and out.dtype == jnp.float32
    assert bool(jnp.all(jnp.isfinite(out)))
    print("KERNEL_OK")
</pallas_src>

<mosaic_0001>
module attributes {stable_mosaic.version = 11 : i64} {
  func.func @gat_project_kernel(%arg0: i32, %arg1: i32, %arg2: memref<16x16xf32, #tpu.memory_space<vmem>>, %arg3: memref<1x16x16xf32, #tpu.memory_space<vmem>>, %arg4: memref<1x16x16xf32, #tpu.memory_space<vmem>>) attributes {dimension_semantics = [#tpu.dimension_semantics<parallel>, #tpu.dimension_semantics<parallel>], iteration_bounds = array<i64: 2, 1>, scalar_prefetch = 0 : i64, scratch_operands = 0 : i64, tpu.core_type = #tpu.core_type<tc>, window_params = [{transform_indices = @transform_0, window_bounds = array<i64: 16, 16>}, {transform_indices = @transform_1, window_bounds = array<i64: 1, 16, 16>}, {transform_indices = @transform_2, window_bounds = array<i64: 1, 16, 16>}]} {
    %c0 = arith.constant 0 : index
    %c0_0 = arith.constant 0 : index
    %0 = vector.load %arg2[%c0, %c0_0] : memref<16x16xf32, #tpu.memory_space<vmem>>, vector<16x16xf32>
    %c0_1 = arith.constant 0 : index
    %c0_2 = arith.constant 0 : index
    %c0_3 = arith.constant 0 : index
    %1 = vector.load %arg3[%c0_1, %c0_2, %c0_3] : memref<1x16x16xf32, #tpu.memory_space<vmem>>, vector<1x16x16xf32>
    %2 = vector.shape_cast %1 : vector<1x16x16xf32> to vector<16x16xf32>
    %cst = arith.constant dense<0.000000e+00> : vector<16x16xf32>
    %3 = tpu.matmul %0, %2, %cst {dimension_numbers = #tpu.dot_dimension_numbers<[1], [0], [0], [1], [0, 0, 1, 1], [], []>} : vector<16x16xf32>, vector<16x16xf32>, vector<16x16xf32> -> vector<16x16xf32>
    %c0_4 = arith.constant 0 : index
    %c0_5 = arith.constant 0 : index
    %c0_6 = arith.constant 0 : index
    %4 = vector.load %arg4[%c0_4, %c0_5, %c0_6] : memref<1x16x16xf32, #tpu.memory_space<vmem>>, vector<1x16x16xf32>
    %5 = vector.shape_cast %4 : vector<1x16x16xf32> to vector<16x16xf32>
    %6 = vector.shape_cast %3 : vector<16x16xf32> to vector<1x16x16xf32>
    tpu.vector_store %arg4[%c0_4, %c0_5, %c0_6], %6 {strides = array<i32>} : memref<1x16x16xf32, #tpu.memory_space<vmem>>, vector<1x16x16xf32>,
    return
  }
  func.func @transform_0(%arg0: i32, %arg1: i32) -> (i32, i32) {
    %c0_i32 = arith.constant 0 : i32
    %c0_i32_0 = arith.constant 0 : i32
    return %arg1, %c0_i32 : i32, i32
  }
  func.func @transform_1(%arg0: i32, %arg1: i32) -> (i32, i32, i32) {
    %c0_i32 = arith.constant 0 : i32
    %c0_i32_0 = arith.constant 0 : i32
    %c0_i32_1 = arith.constant 0 : i32
    return %arg0, %c0_i32, %c0_i32_0 : i32, i32, i32
  }
  func.func @transform_2(%arg0: i32, %arg1: i32) -> (i32, i32, i32) {
    %c0_i32 = arith.constant 0 : i32
    %c0_i32_0 = arith.constant 0 : i32
    return %arg0, %arg1, %c0_i32 : i32, i32, i32
  }
}

</mosaic_0001>

<bundles_post_ra>
// kernel: tpu_custom_call.1
= control target key start
LH: loop header
LB: loop body
LE: loop exit
PB: predicated region body
PF: predicated region fallthrough
CT: control target
= control target key end

     0   :  { %7 = vsyncpa [#allocation3], 0  ;;  %s784_s0 = inlined_call_operand.hbm [shape: f32[16,16], index: 0, kind: input, shape index: {}]   ;;  %s785_s1 = inlined_call_operand.hbm [shape: f32[2,16,16], index: 1, kind: input, shape index: {}]   ;;  %s786_s2 = inlined_call_operand.hbm [shape: f32[2,16,16], index: 2, kind: output, shape index: {}]  }
   0x1   :  { %8 = vsyncpa [#allocation6], 0 }
   0x2   :  { %10 = vsyncpa [#allocation6 + $0x1], 0 }
   0x3   :  { %11 = vsyncpa [#allocation4], 0 }
   0x4   :  { %13 = vsyncpa [#allocation4 + $0x1], 0  ;;  %s625_s9 = smov 0   ;;  %s627_s10 = smov 0  }
   0x5   :  { %s629_s11 = smov 0   ;;  %s631_s12 = smov 0  }
   0x6   :  { %s633_s13 = smov 0   ;;  %s635_s14 = smov 0  }
   0x7 LB: > { %s357_s15 = sadd.s32 4294967295, %s603_s14   ;;  %s358_s16 = sadd.s32 4294967294, %s603_s14   ;;  %s603_s14 = sphi %s635_s14, %s19_s14   ;;  %s599_s13 = sphi %s633_s13, %s798_s13   ;;  %s595_s12 = sphi %s631_s12, %s797_s12   ;;  %s591_s11 = sphi %s629_s11, %s796_s11   ;;  %s587_s10 = sphi %s627_s10, %s795_s10   ;;  %s583_s9 = sphi %s625_s9, %s794_s9  }
   0x8   : > { %p77_p0 = scmp.ne.s32.totalorder %s587_s10, %s583_s9  ;;  %p659_p1 = scmp.eq.s32.totalorder %s357_s15, 0 }
   0x9   : > { %p663_p2 = scmp.eq.s32.totalorder %s357_s15, 1  ;;  %p109_p3 = scmp.eq.s32.totalorder %s358_s16, 1 }
   0xa   : > { %p669_p4 = por %p659_p1, %p77_p0  ;;  %p359_p5 = scmp.ge.s32.totalorder %s603_s14, 1 }
   0xb   : > { %p674_p6 = por %p109_p3, %p77_p0  ;;  %p116_p7 = scmp.lt.s32.totalorder %s603_s14, 3 }
   0xc   : > { %s130_s23 = sshll.u32 %s784_s0, 4  ;;  %s605_s25 = smov [#allocation2]   ;;  %s131_s23 = int_to_ptr.hbm [resolvable:$true] %s130_s23 }
   0xd   : > { %p682_p8 = pnand %p359_p5, %p116_p7  ;;  %s132_s26 = sshll.u32 %s605_s25, 4  ;;  %s133_s26 = int_to_ptr.vmem [resolvable:$true] %s132_s26 }
   0xe   : > { %p361_p11 = scmp.ge.s32.totalorder %s603_s14, 2  ;;  %s606_s27 = smov 128  }
   0xf   : > { %p388_p9 = pneg %p682_p8  ;;  %s607_s28 = smov 8  }
  0x10   : > { %s31_s29 = sadd.s32 1, %s599_s13  ;;  %s64_s30 = sadd.s32 1, %s591_s11 }
  0x11   : > { %p389_p10 = pnand %p388_p9, %p659_p1  ;;  %p33_p12 = scmp.ge.s32.totalorder %s31_s29, 2 }
  0x12   : > { %p71_p13 = scmp.ne.s32.totalorder %s591_s11, %s587_s10  ;;  %p72_p0 = scmp.eq.s32.totalorder %s603_s14, 0 }
  0x13   : > { %391 = dma.hbm_to_vmem [thread:$0]  (!%p389_p10), %s131_s23, 256, %s133_s26, [#allocation3], %s606_s27, %s606_s27, %s607_s28  }
  0x14   : > { %s800_s29 = smov (%p33_p12, %s31_s29), 0  ;;  %p701_p3 = por %p72_p0, %p71_p13 }
  0x15   : > { %p707_p5 = por %p663_p2, %p71_p13  ;;  %s61_s5 = ssub.s32 %s599_s13, %s800_s29 }
  0x16   : > { %p401_p7 = scmp.lt.s32.totalorder %s603_s14, 2  ;;  %p62_p9 = scmp.eq.s32.totalorder %s61_s5, 0 }
  0x17   : > { %s146_s6 = sand.u32 1, %s591_s11   ;;  %s376_s15 = sshll.u32 %s599_s13, 4 }
  0x18   : > { %s362_s7 = sshll.u32 %s146_s6, 4  ;;  %s155_s22 = scalar_lea.hbm %s785_s1, %s376_s15 }
  0x19   : > { %s716_s8 = scalar_select %p62_p9, %s591_s11, %s64_s30  }
  0x1a   : > { %s150_s23 = scalar_lea.vmem [#allocation5], %s362_s7  ;;  %s156_s18 = sshll.u32 %s155_s22, 4  ;;  %s157_s18 = int_to_ptr.hbm [resolvable:$true] %s156_s18 }
  0x1b   : > { %s158_s25 = sshll.u32 %s150_s23, 4  ;;  %p393_p2 = pnand %p401_p7, %p701_p3  ;;  %s159_s25 = int_to_ptr.vmem [resolvable:$true] %s158_s25 }
  0x1c   : > { %s147_s26 = scalar_lea.sflag [#allocation6], %s146_s6  ;;  %170 = sbr.rel (%p682_p8) target bundleno = 173 (0xad), region = 28 }
  0x1d   : > { %395 = dma.hbm_to_vmem [thread:$0]  (!%p393_p2), %s157_s18, 256, %s159_s25, %s147_s26, %s606_s27, %s606_s27, %s607_s28  }
  0x21   : > { %570 = dma.done.wait (%p659_p1), [#allocation3], 256  }
  0x22   : > { %572 = vsyncadd (%p659_p1), [#allocation3], 4294967040  ;;  %s734_s30 = sand.u32 1, %s587_s10  }
  0x23   : > { %s367_s3 = sshll.u32 %s734_s30, 4  ;;  %s178_s5 = scalar_lea.sflag [#allocation6], %s734_s30 }
  0x24   : > { %s181_s6 = scalar_lea.vmem [#allocation5], %s367_s3 }
  0x25   : > { %574 = dma.done.wait (%p669_p4), %s178_s5, 256  }
  0x26   : > { %576 = vsyncadd (%p669_p4), %s178_s5, 4294967040  ;;  %v208_v0 = vld [vmem:[%s181_s6 + $0x8] sm:$0xff]  ;;  %v207_v1 = vld [vmem:[%s181_s6] sm:$0xff]  ;;  %vm209_vm0 = vcmask 130048   ;;  %s377_s17 = sshll.u32 %s595_s12, 4  ;;  %s202_s28 = scalar_lea.vmem [#allocation7], %s367_s3 }
  0x27   : > { %230 = vmatpush.msra.mxu0 %v208_v0  ;;  %378 = vmatpush.msra.mxu1 %v208_v0  ;;  %v205_v2 = vld [vmem:[#allocation2] sm:$0xff]  ;;  %v206_v3 = vld [vmem:[#allocation2 + $0x8] sm:$0xff]  ;;  %s255_s19 = scalar_lea.hbm %s786_s2, %s377_s17  ;;  %s256_s7 = sshll.u32 %s202_s28, 4  ;;  %s257_s7 = int_to_ptr.vmem [resolvable:$true] %s256_s7 }
  0x28   : > { %s258_s15 = sshll.u32 %s255_s19, 4  ;;  %s242_s16 = scalar_lea.sflag [#allocation4], %s734_s30  ;;  %s259_s15 = int_to_ptr.hbm [resolvable:$true] %s258_s15 }
  0x29   : > { %231 = vmatpush.msra.mxu0 %v207_v1  ;;  %379 = vmatpush.msra.mxu1 %v207_v1  ;;  %s531_s21 = sshra.s32 %s259_s15, 4  ;;  %s537_s25 = scalar_lea.hbm %s786_s2, 32  ;;  %s532_s21 = int_to_ptr.hbm [resolvable:$true] %s531_s21 }
  0x2a   : > { %369 = vmatmul.msk.f32.vlgmr.msra.gmra.mxu0 %vm209_vm0, %v205_v2  ;;  %370 = vmatmul.msk.f32.vlgmr.msra.gmra.mxu1 %vm209_vm0, %v206_v3  ;;  %s533_s12 = scalar_lea.hbm %s532_s21, 16  ;;  %p538_p10 = scmp.lt.s32.totalorder %s532_s21, %s786_s2 }
  0x2b   : > { %p534_p1 = scmp.ne.s32.totalorder %s532_s21, %s533_s12  ;;  %p539_p12 = scmp.lt.s32.totalorder %s537_s25, %s533_s12 }
  0x2d   : > { %p535_p4 = pnand %p534_p1, %p707_p5  ;;  %p540_p13 = por %p539_p12, %p538_p10 }
  0x2f   : > { %p536_p8 = pneg %p535_p4 }
  0x31   : > { %p541_p0 = pnand %p540_p13, %p536_p8 }
  0xa7   : > { %v233_v4 = vpop.f32.mrf.mxu0  ;;  %v236_v5 = vpop.f32.mrf.mxu1 }
  0xa8   : > { %239 = vst.msk [vmem:[%s202_s28] sm:$0xff] %vm209_vm0, %v233_v4 }
  0xa9   : > { %240 = vst.msk [vmem:[%s202_s28 + $0x8] sm:$0xff] %vm209_vm0, %v236_v5 }
  0xaa   : > { %544 = shalt.err (!%p541_p0)
}
  0xab   : > { %s608_s30 = smov 128   ;;  %s609_s3 = smov 8  }
  0xac   : > { %386 = dma.vmem_to_hbm [thread:$0]  (%p707_p5), %s257_s7, 256, %s259_s15, %s242_s16, %s608_s30, %s608_s30, %s609_s3  }
  0xad PF: > { %s273_s5 = sand.u32 1, %s583_s9   ;;  %p397_p3 = pnand %p361_p11, %p674_p6 }
  0xae   : > { %s274_s6 = scalar_lea.sflag [#allocation4], %s273_s5 }
  0xaf   : > { %p398_p7 = pneg %p397_p3 }
  0xb1   : > { %578 = dma.done.wait (%p398_p7), %s274_s6, 256  }
  0xb2   : > { %580 = vsyncadd (%p398_p7), %s274_s6, 4294967040  ;;  %s19_s14 = sadd.s32 1, %s603_s14   ;;  %s794_s9 = smov %s587_s10 }
  0xb3   : > { %p16_p9 = scmp.ge.s32.totalorder %s19_s14, 4   ;;  %s795_s10 = smov %s591_s11 }
  0xb4   : > { %s796_s11 = smov %s716_s8  ;;  %s797_s12 = smov %s599_s13 }
  0xb5   : > { %s798_s13 = smov %s800_s29  ;;  %18 = sbr.rel (!%p16_p9) target bundleno = 7 (0x7), region = 79 }
  0xba   :  { %280 = vsyncpa [#allocation3], 1 }
  0xbb   :  { %282 = vsyncpa [#allocation3 + $0x1], 1 }
  0xbc   :  { %283 = vsyncpa [#allocation6], 1 }
  0xbd   :  { %285 = vsyncpa [#allocation6 + $0x1], 1 }
  0xbe   :  { %286 = vsyncpa [#allocation4], 1 }
  0xbf   :  { %288 = vsyncpa [#allocation4 + $0x1], 1 }

</bundles_post_ra>
